<compile_context>
chip_gen: v7x
topology: tpu7x:2x2x1
jax: 0.10.0
libtpu: 0.0.40
codegen_flags: <defaults>
</compile_context>

<pallas_src>
import functools

import numpy as np
import jax
import jax.numpy as jnp
from jax import lax
from jax.experimental import pallas as pl
from jax.experimental.pallas import tpu as pltpu


# ----------------------------------------------------------------------------- kernel


def _ldam_kernel(pred_ref, target_ref, m_ref, out_ref, acc_ref,
                 *, s, n_total, tile_n, steps_per_core, needs_mask):
    # pred_ref:   (TILE_N, C) input dtype (f32/bf16), upcast in-kernel
    # target_ref: (TILE_N, 1) int32
    # m_ref:      (1, C)      f32 (resident)
    # out_ref:    (1, 8, 128) f32  per-shard partial sum (written on last step only)
    # acc_ref:    (TILE_N, 1) f32  VMEM vector accumulator scratch
    i = pl.program_id(1)  # reduction ("arbitrary") axis within this shard

    @pl.when(i == 0)
    def _init():
        acc_ref[...] = jnp.zeros_like(acc_ref)

    pred = pred_ref[...].astype(jnp.float32)         # (TN, C)
    tgt = target_ref[...]                            # (TN, 1) int32
    m_b = m_ref[...]                                 # (1, C)  f32

    tn, c = pred.shape
    class_ids = lax.broadcasted_iota(jnp.int32, (tn, c), 1)
    onehot = (class_ids == tgt).astype(jnp.float32)  # (TN, C)

    # onehot * batch_m == onehot * m_list (broadcast), so the batch_m reduce is fused out:
    #   z = s * where(onehot, pred - m[target], pred)
    z = s * (pred - onehot * m_b)                                       # (TN, C)
    z_max = jnp.max(z, axis=-1, keepdims=True)                          # (TN, 1)
    lse = z_max + jnp.log(jnp.sum(jnp.exp(z - z_max), axis=-1, keepdims=True))
    true_logit = s * jnp.sum(onehot * (pred - m_b), axis=-1, keepdims=True)
    per_sample = lse - true_logit                                       # (TN, 1)

    if needs_mask:
        # Global (unclamped) block index; redundant/partial blocks contribute 0.
        gb = pl.program_id(0) * steps_per_core + i
        row_ids = gb * tile_n + lax.broadcasted_iota(jnp.int32, (tn, 1), 0)
        per_sample = jnp.where(row_ids < n_total, per_sample, 0.0)      # keep as select

    acc_ref[...] += per_sample

    @pl.when(i == steps_per_core - 1)
    def _finalize():
        partial = jnp.sum(acc_ref[...])
        out_ref[...] = jnp.full(out_ref.shape, partial, dtype=jnp.float32)


# ----------------------------------------------------------------------------- sizing


def _physical_vmem_bytes():
    try:
        info = pltpu.get_tpu_info()
        v = getattr(info, "vmem_capacity_bytes", None)
        if isinstance(v, int) and v > 0:
            return v
    except Exception:
        pass
    return 64 * 1024 * 1024  # v7x floor; conservative default


def _vmem_limit_bytes():
    phys = _physical_vmem_bytes()
    # Leave headroom against physical VMEM; cap requested scoped VMEM at 64 MiB.
    return int(min(64 * 1024 * 1024, (phys * 3) // 4))


def _detect_num_shards():
    # TODO(synk): fold batch into the lane axis for small-C deployments (C << 128)
    # to recover the wasted lane width; current layout keeps C on lanes.
    try:
        info = pltpu.get_tpu_info()
        for name in ("num_tensorcores", "tensorcore_count", "num_cores", "core_count"):
            v = getattr(info, name, None)
            if isinstance(v, int) and 1 <= v <= 8:
                return v
    except Exception:
        pass
    try:
        kind = jax.devices()[0].device_kind.lower()
        if "v7" in kind or "7x" in kind:
            return 2  # v7x: 2 TensorCores per chip
    except Exception:
        pass
    return 1


def _choose_tile_n(n, c, itemsize, budget_bytes):
    if n <= 8:
        return n
    c_pad = -(-c // 128) * 128
    # Per row of tile: 2x double-buffered input (padded lanes)
    #                  + ~4 tile-sized f32 intermediates (upcast/onehot/z/exp)
    #                  + padded target (x2 buffers) + padded accumulator column.
    per_row = c_pad * (2 * itemsize + 4 * 4) + 3 * 128 * 4
    tile = budget_bytes // max(1, per_row)
    tile = max(8, min(int(tile), 8192, n))
    if tile < n:
        tile = max(8, (tile // 8) * 8)  # (8, 128) sublane constraint
    return int(tile)


# ----------------------------------------------------------------------------- wrapper


def ldam_loss(pred, target, m_list, *, s=30.0, loss_weight=1.0,
              tile_n=None, num_shards=None):
    """pred: (N, C) f32/bf16, target: (N,) int, m_list: (C,) f32 -> scalar f32.

    Matches LDAMLoss.forward with weight=None, reduction='mean'.
    """
    n, c = pred.shape

    vmem_limit = _vmem_limit_bytes()
    if tile_n is None:
        tile_n = _choose_tile_n(n, c, pred.dtype.itemsize, (vmem_limit * 85) // 100)
    tile_n = int(tile_n)
    if tile_n >= n:
        tile_n = n
    else:
        tile_n = max(8, (tile_n // 8) * 8)

    num_blocks = pl.cdiv(n, tile_n)
    if num_shards is None:
        num_shards = _detect_num_shards()
    num_shards = max(1, min(int(num_shards), num_blocks))
    steps_per_core = pl.cdiv(num_blocks, num_shards)

    exact_cover = (num_shards * steps_per_core == num_blocks)
    needs_mask = (n % tile_n != 0) or (not exact_cover)

    last_block = num_blocks - 1
    if exact_cover:
        def _blk(cidx, i):
            return cidx * steps_per_core + i
    else:
        def _blk(cidx, i):
            # Clamp redundant trailing steps onto the last valid block (fully masked).
            return jnp.minimum(cidx * steps_per_core + i, last_block)

    target2d = target.reshape(n, 1).astype(jnp.int32)
    m2d = m_list.reshape(1, c).astype(jnp.float32)

    kernel = functools.partial(
        _ldam_kernel,
        s=float(s), n_total=int(n), tile_n=int(tile_n),
        steps_per_core=int(steps_per_core), needs_mask=bool(needs_mask),
    )

    partials = pl.pallas_call(
        kernel,
        out_shape=jax.ShapeDtypeStruct((num_shards, 8, 128), jnp.float32),
        grid_spec=pltpu.PrefetchScalarGridSpec(
            num_scalar_prefetch=0,
            grid=(num_shards, steps_per_core),
            in_specs=[
                pl.BlockSpec((tile_n, c), lambda cidx, i: (_blk(cidx, i), 0)),  # pred
                pl.BlockSpec((tile_n, 1), lambda cidx, i: (_blk(cidx, i), 0)),  # target
                pl.BlockSpec((1, c), lambda cidx, i: (0, 0)),                   # m_list
            ],
            out_specs=pl.BlockSpec((1, 8, 128), lambda cidx, i: (cidx, 0, 0)),
            scratch_shapes=[pltpu.VMEM((tile_n, 1), jnp.float32)],
        ),
        compiler_params=pltpu.CompilerParams(
            dimension_semantics=("parallel", "arbitrary"),
            vmem_limit_bytes=int(vmem_limit),
        ),
    )(pred, target2d, m2d)

    total = jnp.sum(partials[:, 0, 0])
    return jnp.float32(loss_weight) * total * jnp.float32(1.0 / n)


def make_m_list(train_cls_num_list, test_cls_num_list=None, max_m=0.5):
    # Deterministic parameter setup mirroring LDAMLoss.__init__
    if test_cls_num_list is not None:
        test = np.asarray(test_cls_num_list, dtype=np.float64)
        train = np.asarray(train_cls_num_list, dtype=np.float64)
        m_list = np.sqrt(np.sqrt(test / train))
    else:
        m_list = 1.0 / np.sqrt(np.sqrt(np.asarray(train_cls_num_list, dtype=np.float64)))
    m_list = m_list * (max_m / np.max(m_list))
    return jnp.asarray(m_list, dtype=jnp.float32)


if __name__ == "__main__":
    key = jax.random.PRNGKey(0)
    k1, k2 = jax.random.split(key)

    # Small shapes; N deliberately NOT a multiple of the tile so the multi-tile,
    # multi-shard accumulation + partial-tile masking paths are exercised.
    N, C = 20, 8
    train_cls_num_list = [100, 50, 30, 20, 10, 8, 5, 2]
    m_list = make_m_list(train_cls_num_list, max_m=0.5)

    pred = jax.random.normal(k1, (N, C), dtype=jnp.float32)
    target = jax.random.randint(k2, (N,), 0, C, dtype=jnp.int32)

    # Pure-JAX reference (same math, outside Pallas).
    onehot = jax.nn.one_hot(target, C, dtype=jnp.float32)
    batch_m = (onehot * m_list[None, :]).sum(-1, keepdims=True)
    z_ref = 30.0 * (pred - onehot * batch_m)
    ref = jnp.mean(jax.nn.logsumexp(z_ref, axis=-1) - (onehot * z_ref).sum(-1))

    # 1) Auto-tiled / auto-sharded path (whatever the local chip supports).
    loss = ldam_loss(pred, target, m_list, s=30.0, loss_weight=1.0)
    jax.block_until_ready(loss)
    assert jnp.allclose(loss, ref, rtol=1e-5, atol=1e-5), (loss, ref)

    # 2) Forced multi-tile + two-shard path (clamped redundant blocks, row mask).
    loss2 = ldam_loss(pred, target, m_list, s=30.0, loss_weight=1.0,
                      tile_n=8, num_shards=2)
    jax.block_until_ready(loss2)
    assert jnp.allclose(loss2, ref, rtol=1e-5, atol=1e-5), (loss2, ref)

    # 3) Single-tile path (tile_n == N).
    loss3 = ldam_loss(pred, target, m_list, s=30.0, loss_weight=1.0,
                      tile_n=N, num_shards=1)
    jax.block_until_ready(loss3)
    assert jnp.allclose(loss3, ref, rtol=1e-5, atol=1e-5), (loss3, ref)

    print("KERNEL_OK")
</pallas_src>

<mosaic_0001>
module attributes {stable_mosaic.version = 11 : i64} {
  func.func @_ldam_kernel(%arg0: i32, %arg1: i32, %arg2: memref<20x8xf32, #tpu.memory_space<vmem>>, %arg3: memref<20x1xi32, #tpu.memory_space<vmem>>, %arg4: memref<1x8xf32, #tpu.memory_space<vmem>>, %arg5: memref<1x8x128xf32, #tpu.memory_space<vmem>>, %arg6: memref<20x1xf32, #tpu.memory_space<vmem>>) attributes {dimension_semantics = [#tpu.dimension_semantics<parallel>, #tpu.dimension_semantics<arbitrary>], iteration_bounds = array<i64: 1, 1>, scalar_prefetch = 0 : i64, scratch_operands = 1 : i64, tpu.core_type = #tpu.core_type<tc>, window_params = [{transform_indices = @transform_0, window_bounds = array<i64: 20, 8>}, {transform_indices = @transform_1, window_bounds = array<i64: 20, 1>}, {pipeline_mode = #tpu.pipeline_mode<synchronous>, transform_indices = @transform_2, window_bounds = array<i64: 1, 8>}, {transform_indices = @transform_3, window_bounds = array<i64: 1, 8, 128>}]} {
    %c0_i32 = arith.constant 0 : i32
    %0 = arith.cmpi eq, %arg1, %c0_i32 : i32
    %1 = arith.extui %0 : i1 to i32
    %c0_i32_0 = arith.constant 0 : i32
    %2 = arith.cmpi ne, %1, %c0_i32_0 : i32
    scf.if %2 {
      %cst_16 = arith.constant 0.000000e+00 : f32
      %39 = vector.broadcast %cst_16 : f32 to vector<20x1xf32>
      %c0_17 = arith.constant 0 : index
      %c0_18 = arith.constant 0 : index
      %40 = vector.load %arg6[%c0_17, %c0_18] : memref<20x1xf32, #tpu.memory_space<vmem>>, vector<20x1xf32>
      tpu.vector_store %arg6[%c0_17, %c0_18], %39 {strides = array<i32>} : memref<20x1xf32, #tpu.memory_space<vmem>>, vector<20x1xf32>,
    } else {
    }
    %c0 = arith.constant 0 : index
    %c0_1 = arith.constant 0 : index
    %3 = vector.load %arg2[%c0, %c0_1] : memref<20x8xf32, #tpu.memory_space<vmem>>, vector<20x8xf32>
    %c0_2 = arith.constant 0 : index
    %c0_3 = arith.constant 0 : index
    %4 = vector.load %arg3[%c0_2, %c0_3] : memref<20x1xi32, #tpu.memory_space<vmem>>, vector<20x1xi32>
    %c0_4 = arith.constant 0 : index
    %c0_5 = arith.constant 0 : index
    %5 = vector.load %arg4[%c0_4, %c0_5] : memref<1x8xf32, #tpu.memory_space<vmem>>, vector<1x8xf32>
    %6 = tpu.iota {dimensions = array<i32: 1>} : vector<20x8xi32>
    %7 = vector.broadcast %4 : vector<20x1xi32> to vector<20x8xi32>
    %8 = arith.cmpi eq, %6, %7 : vector<20x8xi32>
    %9 = arith.extui %8 : vector<20x8xi1> to vector<20x8xi32>
    %10 = arith.sitofp %9 : vector<20x8xi32> to vector<20x8xf32>
    %11 = vector.broadcast %5 : vector<1x8xf32> to vector<20x8xf32>
    %12 = arith.mulf %10, %11 : vector<20x8xf32>
    %13 = arith.subf %3, %12 : vector<20x8xf32>
    %cst = arith.constant 3.000000e+01 : f32
    %14 = vector.broadcast %cst : f32 to vector<20x8xf32>
    %15 = arith.mulf %14, %13 : vector<20x8xf32>
    %cst_6 = arith.constant dense<0xFF800000> : vector<20xf32>
    %16 = vector.multi_reduction <maximumf>, %15, %cst_6 [1] : vector<20x8xf32> to vector<20xf32>
    %17 = vector.shape_cast %16 : vector<20xf32> to vector<20x1xf32>
    %18 = vector.broadcast %17 : vector<20x1xf32> to vector<20x8xf32>
    %19 = arith.subf %15, %18 : vector<20x8xf32>
    %20 = math.exp %19 : vector<20x8xf32>
    %cst_7 = arith.constant dense<0.000000e+00> : vector<20xf32>
    %21 = vector.multi_reduction <add>, %20, %cst_7 [1] : vector<20x8xf32> to vector<20xf32>
    %22 = vector.shape_cast %21 : vector<20xf32> to vector<20x1xf32>
    %23 = math.log %22 : vector<20x1xf32>
    %24 = arith.addf %17, %23 : vector<20x1xf32>
    %25 = vector.broadcast %5 : vector<1x8xf32> to vector<20x8xf32>
    %26 = arith.subf %3, %25 : vector<20x8xf32>
    %27 = arith.mulf %10, %26 : vector<20x8xf32>
    %cst_8 = arith.constant dense<0.000000e+00> : vector<20xf32>
    %28 = vector.multi_reduction <add>, %27, %cst_8 [1] : vector<20x8xf32> to vector<20xf32>
    %29 = vector.shape_cast %28 : vector<20xf32> to vector<20x1xf32>
    %cst_9 = arith.constant 3.000000e+01 : f32
    %30 = vector.broadcast %cst_9 : f32 to vector<20x1xf32>
    %31 = arith.mulf %30, %29 : vector<20x1xf32>
    %32 = arith.subf %24, %31 : vector<20x1xf32>
    %c0_10 = arith.constant 0 : index
    %c0_11 = arith.constant 0 : index
    %33 = vector.load %arg6[%c0_10, %c0_11] : memref<20x1xf32, #tpu.memory_space<vmem>>, vector<20x1xf32>
    %34 = arith.addf %33, %32 : vector<20x1xf32>
    %c0_12 = arith.constant 0 : index
    %c0_13 = arith.constant 0 : index
    %35 = vector.load %arg6[%c0_12, %c0_13] : memref<20x1xf32, #tpu.memory_space<vmem>>, vector<20x1xf32>
    tpu.vector_store %arg6[%c0_12, %c0_13], %34 {strides = array<i32>} : memref<20x1xf32, #tpu.memory_space<vmem>>, vector<20x1xf32>,
    %c0_i32_14 = arith.constant 0 : i32
    %36 = arith.cmpi eq, %arg1, %c0_i32_14 : i32
    %37 = arith.extui %36 : i1 to i32
    %c0_i32_15 = arith.constant 0 : i32
    %38 = arith.cmpi ne, %37, %c0_i32_15 : i32
    scf.if %38 {
      %c0_16 = arith.constant 0 : index
      %c0_17 = arith.constant 0 : index
      %39 = vector.load %arg6[%c0_16, %c0_17] : memref<20x1xf32, #tpu.memory_space<vmem>>, vector<20x1xf32>
      %40 = vector.shape_cast %39 : vector<20x1xf32> to vector<1x20x1xf32>
      %cst_18 = arith.constant dense<0.000000e+00> : vector<1xf32>
      %41 = vector.multi_reduction <add>, %40, %cst_18 [1, 2] : vector<1x20x1xf32> to vector<1xf32>
      %42 = vector.shape_cast %41 : vector<1xf32> to vector<1x1x1xf32>
      %43 = vector.extract %42[0, 0, 0] : f32 from vector<1x1x1xf32>
      %44 = vector.broadcast %43 : f32 to vector<1x8x128xf32>
      %c0_19 = arith.constant 0 : index
      %c0_20 = arith.constant 0 : index
      %c0_21 = arith.constant 0 : index
      %45 = vector.load %arg5[%c0_19, %c0_20, %c0_21] : memref<1x8x128xf32, #tpu.memory_space<vmem>>, vector<1x8x128xf32>
      tpu.vector_store %arg5[%c0_19, %c0_20, %c0_21], %44 {strides = array<i32>} : memref<1x8x128xf32, #tpu.memory_space<vmem>>, vector<1x8x128xf32>,
    } else {
    }
    return
  }
  func.func @transform_0(%arg0: i32, %arg1: i32) -> (i32, i32) {
    %c1_i32 = arith.constant 1 : i32
    %0 = arith.muli %arg0, %c1_i32 : i32
    %1 = arith.addi %0, %arg1 : i32
    %c0_i32 = arith.constant 0 : i32
    %c0_i32_0 = arith.constant 0 : i32
    return %1, %c0_i32 : i32, i32
  }
  func.func @transform_1(%arg0: i32, %arg1: i32) -> (i32, i32) {
    %c1_i32 = arith.constant 1 : i32
    %0 = arith.muli %arg0, %c1_i32 : i32
    %1 = arith.addi %0, %arg1 : i32
    %c0_i32 = arith.constant 0 : i32
    %c0_i32_0 = arith.constant 0 : i32
    return %1, %c0_i32 : i32, i32
  }
  func.func @transform_2(%arg0: i32, %arg1: i32) -> (i32, i32) {
    %c0_i32 = arith.constant 0 : i32
    %c0_i32_0 = arith.constant 0 : i32
    %c0_i32_1 = arith.constant 0 : i32
    return %c0_i32, %c0_i32_0 : i32, i32
  }
  func.func @transform_3(%arg0: i32, %arg1: i32) -> (i32, i32, i32) {
    %c0_i32 = arith.constant 0 : i32
    %c0_i32_0 = arith.constant 0 : i32
    %c0_i32_1 = arith.constant 0 : i32
    return %arg0, %c0_i32, %c0_i32_0 : i32, i32, i32
  }
}

</mosaic_0001>

<bundles_post_ra>
// kernel: tpu_custom_call.1
= control target key start
LH: loop header
LB: loop body
LE: loop exit
PB: predicated region body
PF: predicated region fallthrough
CT: control target
= control target key end

     0   :  { %v275_v2 = vmov 0   ;;  %s355_s0 = inlined_call_operand.vmem [shape: f32[20,8], index: 0, kind: input, shape index: {}]   ;;  %s356_s1 = inlined_call_operand.vmem [shape: s32[20,1], index: 1, kind: input, shape index: {}]   ;;  %s357_s2 = inlined_call_operand.vmem [shape: f32[1,8], index: 2, kind: input, shape index: {}]   ;;  %s358_s3 = inlined_call_operand.hbm [shape: f32[1,8,128], index: 3, kind: output, shape index: {}]  }
   0x1   :  { %v71_v0 = vld [vmem:[%s356_s1] sm:$0xff]  ;;  %v73_v1 = vld [vmem:[%s356_s1 + $0x10] sm:$0xf]  ;;  %237 = vset.pattern.permute.xlu0 %v275_v2  ;;  %238 = vset.pattern.permute.xlu1 %v275_v2 }
   0x2   :  { %8 = vsyncpa [#allocation4], 0  ;;  %78 = vperm.xlu0 %237, %v71_v0   ;;  %84 = vperm.xlu1 %238, %v73_v1   ;;  %v72_v3 = vld [vmem:[%s356_s1 + $0x8] sm:$0xff]  ;;  %v75_v4 = vlaneseq  ;;  %v231_v8 = vld [vmem:[%s357_s2] ss:$0 sm:$0xff]  ;;  %v276_v9 = vmov 0.0  }
   0x3   :  { %v68_v15 = vld [vmem:[%s355_s0] sm:$0xff]  ;;  %v70_v18 = vld [vmem:[%s355_s0 + $0x10] sm:$0xf]  ;;  %vm110_vm3 = vcmask 64512   ;;  %v69_v22 = vld [vmem:[%s355_s0 + $0x8] sm:$0xff]  ;;  %vm117_vm4 = vcmask 60416  }
   0x4   :  { %v76_v5 = vand.u32 127, %v75_v4  ;;  %v148_v40 = vsub.f32 %v68_v15, %v231_v8  ;;  %v150_v44 = vsub.f32 %v70_v18, %v231_v8  ;;  %v149_v45 = vsub.f32 %v69_v22, %v231_v8  ;;  %s277_s0 = smov [#allocation3]  }
   0x5   :  { %vm63_vm5 = vcmask 7168   ;;  %vm66_vm6 = vcmask 3072   ;;  %s208_s24 = sshll.u32 %s277_s0, 4  ;;  %s209_s24 = int_to_ptr.vmem [resolvable:$true] %s208_s24 }
   0x6   :  { %81 = vperm.xlu0 %237, %v72_v3   ;;  %64 = vst.msk [vmem:[#allocation2] sm:$0xff] %vm63_vm5, %v276_v9  ;;  %65 = vst.msk [vmem:[#allocation2 + $0x8] sm:$0xff] %vm63_vm5, %v276_v9  ;;  %s251_s26 = scalar_lea.vmem %s209_s24, 128  ;;  %p256_p1 = scmp.lt.s32.totalorder %s209_s24, %s209_s24 }
   0x7   :  { %67 = vst.msk [vmem:[#allocation2 + $0x10] sm:$0xf] %vm66_vm6, %v276_v9  ;;  %p252_p0 = scmp.ne.s32.totalorder %s209_s24, %s251_s26  ;;  %p257_p2 = scmp.lt.s32.totalorder %s251_s26, %s251_s26 }
   0x9   :  { %p258_p3 = por %p257_p2, %p256_p1 }
   0xb   :  { %p259_p4 = pnand %p258_p3, %p252_p0 }
   0xd   :  { %v169_v62 = vld [vmem:[#allocation2] sm:$0xff] }
  0x81   :  { %v79_v6 = vpop.permute.xlu0 %78  ;;  %v85_v7 = vpop.permute.xlu1 %84 }
  0x82   :  { %vm86_vm0 = vcmp.eq.s32.totalorder %v76_v5, %v79_v6  ;;  %vm88_vm1 = vcmp.eq.s32.totalorder %v76_v5, %v85_v7  ;;  %v170_v7 = vld [vmem:[#allocation2 + $0x8] sm:$0xff] }
  0x83   :  { %v228_v10 = vsel %vm86_vm0, 1.0, %v276_v9  ;;  %v230_v11 = vsel %vm88_vm1, 1.0, %v276_v9 }
  0x84   :  { %v101_v12 = vmul.f32 %v231_v8, %v228_v10  ;;  %v103_v13 = vmul.f32 %v231_v8, %v230_v11  ;;  %v151_v43 = vmul.f32 %v228_v10, %v148_v40  ;;  %v153_v49 = vmul.f32 %v230_v11, %v150_v44 }
  0x85   :  { %v82_v14 = vpop.permute.xlu0 %81 }
  0x86   :  { %vm87_vm2 = vcmp.eq.s32.totalorder %v76_v5, %v82_v14  ;;  %v104_v16 = vsub.f32 %v68_v15, %v101_v12  ;;  %v106_v21 = vsub.f32 %v70_v18, %v103_v13  ;;  %v154_v47 = vsel %vm110_vm3, %v151_v43, 0.0  ;;  %v171_v13 = vld [vmem:[#allocation2 + $0x10] sm:$0xf] }
  0x87   :  { %v229_v17 = vsel %vm87_vm2, 1.0, %v276_v9  ;;  %v160_v51 = vsel %vm117_vm4, %v153_v49, 0.0 }
  0x88   :  { %v102_v19 = vmul.f32 %v231_v8, %v229_v17  ;;  %v107_v20 = vmul.f32 30.0, %v104_v16  ;;  %v109_v26 = vmul.f32 30.0, %v106_v21  ;;  %v152_v50 = vmul.f32 %v229_v17, %v149_v45 }
  0x8a   :  { %v111_v23 = vsel %vm110_vm3, %v107_v20, -inf  ;;  %v105_v24 = vsub.f32 %v69_v22, %v102_v19  ;;  %v118_v28 = vsel %vm117_vm4, %v109_v26, -inf  ;;  %v157_v52 = vsel %vm110_vm3, %v152_v50, 0.0 }
  0x8b   :  { %112 = vmax.xlane.f32.xlu1 %v111_v23 }
  0x8c   :  { %v108_v25 = vmul.f32 30.0, %v105_v24 }
  0x8e   :  { %v114_v27 = vsel %vm110_vm3, %v108_v25, -inf }
  0x8f   :  { %115 = vmax.xlane.f32.xlu0 %v114_v27 }
  0x93   :  { %119 = vmax.xlane.f32.xlu0 %v118_v28 }
 0x118   :  { %v113_v29 = vpop.xlane.xlu1 %112 }
 0x119   :  { %v121_v30 = vsub.f32 %v107_v20, %v113_v29 }
 0x11b   :  { %v124_v31 = vmul.f32 1.442695, %v121_v30 }
 0x11c   :  { %v116_v32 = vpop.xlane.xlu0 %115 }
 0x11d   :  { %239 = vpow2.f32 %v124_v31  ;;  %v122_v33 = vsub.f32 %v108_v25, %v116_v32 }
 0x11f   :  { %v126_v34 = vmul.f32 1.442695, %v122_v33 }
 0x120   :  { %v120_v35 = vpop.xlane.xlu0 %119 }
 0x121   :  { %241 = vpow2.f32 %v126_v34  ;;  %v123_v36 = vsub.f32 %v109_v26, %v120_v35 }
 0x123   :  { %v128_v37 = vmul.f32 1.442695, %v123_v36 }
 0x125   :  { %243 = vpow2.f32 %v128_v37 }
 0x127   :  { %v240_v38 = vpop.eup %239 }
 0x128   :  { %v130_v39 = vsel %vm110_vm3, %v240_v38, 0.0 }
 0x129   :  { %131 = vadd.xlane.f32.xlu1 %v130_v39 }
 0x12b   :  { %v242_v41 = vpop.eup %241 }
 0x12c   :  { %v133_v42 = vsel %vm110_vm3, %v242_v41, 0.0 }
 0x12d   :  { %134 = vadd.xlane.f32.xlu0 %v133_v42 }
 0x12f   :  { %v244_v46 = vpop.eup %243 }
 0x130   :  { %v136_v48 = vsel %vm117_vm4, %v244_v46, 0.0 }
 0x131   :  { %155 = vadd.xlane.f32.xlu0 %v154_v47  ;;  %137 = vadd.xlane.f32.xlu1 %v136_v48 }
 0x135   :  { %161 = vadd.xlane.f32.xlu0 %v160_v51  ;;  %158 = vadd.xlane.f32.xlu1 %v157_v52 }
 0x1b6   :  { %v132_v53 = vpop.xlane.xlu1 %131 }
 0x1b7   :  { %245 = vlog2.f32 %v132_v53 }
 0x1ba   :  { %v135_v54 = vpop.xlane.xlu0 %134 }
 0x1bb   :  { %247 = vlog2.f32 %v135_v54 }
 0x1be   :  { %v138_v55 = vpop.xlane.xlu1 %137  ;;  %v156_v57 = vpop.xlane.xlu0 %155 }
 0x1bf   :  { %249 = vlog2.f32 %v138_v55  ;;  %v163_v60 = vmul.f32 30.0, %v156_v57 }
 0x1c1   :  { %v246_v56 = vpop.eup %245 }
 0x1c2   :  { %v140_v58 = vmul.f32 0.6931472, %v246_v56  ;;  %v159_v63 = vpop.xlane.xlu1 %158  ;;  %v162_v6 = vpop.xlane.xlu0 %161 }
 0x1c3   :  { %v164_v4 = vmul.f32 30.0, %v159_v63  ;;  %v165_v11 = vmul.f32 30.0, %v162_v6 }
 0x1c4   :  { %v145_v59 = vadd.f32 %v140_v58, %v113_v29 }
 0x1c5   :  { %v248_v61 = vpop.eup %247 }
 0x1c6   :  { %v142_v0 = vmul.f32 0.6931472, %v248_v61  ;;  %v166_v1 = vsub.f32 %v145_v59, %v163_v60 }
 0x1c8   :  { %v172_v2 = vadd.f32 %v169_v62, %v166_v1  ;;  %v146_v3 = vadd.f32 %v142_v0, %v116_v32 }
 0x1c9   :  { %v250_v5 = vpop.eup %249 }
 0x1ca   :  { %176 = vst.msk [vmem:[#allocation2] sm:$0xff] %vm63_vm5, %v172_v2  ;;  %v144_v8 = vmul.f32 0.6931472, %v250_v5  ;;  %v167_v9 = vsub.f32 %v146_v3, %v164_v4 }
 0x1cc   :  { %v147_v10 = vadd.f32 %v144_v8, %v120_v35  ;;  %v173_v12 = vadd.f32 %v170_v7, %v167_v9 }
 0x1ce   :  { %v168_v14 = vsub.f32 %v147_v10, %v165_v11  ;;  %177 = vst.msk [vmem:[#allocation2 + $0x8] sm:$0xff] %vm63_vm5, %v173_v12 }
 0x1d0   :  { %v174_v15 = vadd.f32 %v171_v13, %v168_v14 }
 0x1d1   :  { %v183_v16 = vld [vmem:[#allocation2] sm:$0xff] }
 0x1d2   :  { %179 = vst.msk [vmem:[#allocation2 + $0x10] sm:$0xf] %vm66_vm6, %v174_v15  ;;  %v186_v19 = vsel %vm63_vm5, %v183_v16, 0.0 }
 0x1d5   :  { %v184_v17 = vld [vmem:[#allocation2 + $0x8] sm:$0xff] }
 0x1d6   :  { %v187_v18 = vsel %vm63_vm5, %v184_v17, 0.0 }
 0x1d7   :  { %v188_v21 = vadd.f32 %v187_v18, %v186_v19 }
 0x1d9   :  { %v185_v20 = vld [vmem:[#allocation2 + $0x10] sm:$0xf] }
 0x1da   :  { %v189_v22 = vsel %vm66_vm6, %v185_v20, 0.0 }
 0x1db   :  { %v190_v23 = vadd.f32 %v189_v22, %v188_v21 }
 0x1dd   :  { %191 = vadd.xlane.f32.xlu1 %v190_v23 }
 0x26a   :  { %v192_v24 = vpop.xlane.xlu1 %191 }
 0x26b   :  { %v193_v25 = vrot.slane %v192_v24, 4 }
 0x26d   :  { %v194_v26 = vadd.f32 %v193_v25, %v192_v24 }
 0x26f   :  { %v195_v27 = vrot.slane %v194_v26, 2 }
 0x271   :  { %v196_v28 = vadd.f32 %v195_v27, %v194_v26 }
 0x273   :  { %v197_v29 = vrot.slane %v196_v28, 1 }
 0x275   :  { %v198_v30 = vadd.f32 %v197_v29, %v196_v28 }
 0x277   :  { %232 = vpush %v198_v30 }
 0x2a8   :  { %s233_s25 = spop %232 }
 0x2a9   :  { %v200_v31 = vstv %s233_s25 }
 0x2aa   :  { %201 = vst [vmem:[#allocation3] sm:$0xff] %v200_v31 }
 0x2ab   :  { %262 = shalt.err (!%p259_p4)
}
 0x2ac   :  { %s263_s29 = scalar_lea.hbm %s358_s3, 128 }
 0x2ad   :  { %p264_p5 = scmp.ne.s32.totalorder %s358_s3, %s263_s29  ;;  %p267_p6 = scmp.lt.u32.totalorder %s263_s29, %s358_s3 }
 0x2af   :  { %p269_p7 = pnand %p267_p6, %p264_p5 }
 0x2b1   :  { %272 = shalt.err (!%p269_p7)
}
 0x2b2   :  { %211 = dma.vmem_to_hbm [thread:$0]  %s209_s24, 128, %s358_s3, [#allocation4]  }
 0x2b3   :  { %273 = dma.done.wait [#allocation4], 128  }
 0x2b4   :  { %274 = vsyncadd [#allocation4], 4294967168 }
 0x2b5   :  { %215 = vsyncpa [#allocation4], 1 }

</bundles_post_ra>
